<compile_context>
chip_gen: v7x
topology: tpu7x:2x2x1
jax: 0.10.0
libtpu: 0.0.40
codegen_flags: <defaults>
</compile_context>

<pallas_src>
import math

import jax
import jax.numpy as jnp
from jax import lax
from jax.experimental import pallas as pl
from jax.experimental.pallas import tpu as pltpu

BN_EPS = 1e-5
LEAKY_SLOPE = 0.2
ADV_WEIGHT = 1e-3
DIMENSION = 4          # `DIMENSION` is an undefined global in the PyTorch source; pick 4 channels.
BCE_LOG_CLAMP = 100.0  # PyTorch BCELoss clamps log() at -100 -> per-element NLL <= 100.


# ---------------------------------------------------------------------------
# Pallas kernels
# ---------------------------------------------------------------------------
def _make_conv_s2_kernel(ho, wh):
    """Fused 3x3 / stride-2 conv (+ folded BN scale + LeakyReLU).

    Inputs are the 4 stride-2 phases of the padded image, flattened to
    (Hh*Wh + 8, C); tap (kh, kw) is the contiguous slice starting at
    (kh//2)*Wh + (kw//2) of phase (kh%2, kw%2).  Output positions live on an
    (ho, wh=wo+1) grid; the junk column is sliced off by the wrapper.
    """
    L = ho * wh

    def kernel(p00_ref, p01_ref, p10_ref, p11_ref, w_ref, o_ref):
        phase = ((p00_ref, p01_ref), (p10_ref, p11_ref))
        acc = None
        for kh in range(3):
            for kw in range(3):
                pr = phase[kh % 2][kw % 2]
                off = (kh // 2) * wh + (kw // 2)
                lhs = pr[0, off:off + L, :]                      # (L, C) bf16, contiguous
                y = jnp.dot(lhs, w_ref[3 * kh + kw],
                            preferred_element_type=jnp.float32)  # MXU, f32 accumulate
                acc = y if acc is None else acc + y
        acc = jnp.where(acc > 0, acc, LEAKY_SLOPE * acc)          # LeakyReLU epilogue
        o_ref[0] = acc.astype(o_ref.dtype)

    return kernel


def _make_final_bce_kernel(ho, wo, wp):
    """Final 3x3 / stride-1 conv to 1 channel fused with BCE(sigmoid(z), ones).

    The real weight column is broadcast across all 128 lanes (no lane mask);
    the wrapper divides the summed result by 128.  Output layout is (ho, wp)
    per image, so the wp-wo junk columns are masked out of the softplus sum.
    """
    L = ho * wp

    def kernel(f_ref, w_ref, o_ref):
        z = None
        for kh in range(3):
            for kw in range(3):
                off = kh * wp + kw
                lhs = f_ref[0, off:off + L, :]                    # (L, 512) bf16, contiguous
                y = jnp.dot(lhs, w_ref[3 * kh + kw],
                            preferred_element_type=jnp.float32)   # (L, 128), lanes identical
                z = y if z is None else z + y
        nz = -z
        # numerically-stable softplus(-z) = -log(sigmoid(z))
        nll = jnp.maximum(nz, 0.0) + jnp.log(1.0 + jnp.exp(-jnp.abs(nz)))
        nll = jnp.minimum(nll, BCE_LOG_CLAMP)
        q = lax.broadcasted_iota(jnp.int32, nll.shape, 0)          # mask junk output columns
        nll = jnp.where((q % wp) < wo, nll, 0.0)
        o_ref[0] = jnp.sum(nll, axis=0, keepdims=True)             # (1, 128) lane-dense partial

    return kernel


def _mse_kernel(a_ref, d_ref, o_ref):
    # Resident (1, 8, 128) f32 output accumulator; per-step sum over the leading
    # tile axis is pure VALU vreg adds (no per-step cross-lane XLU reduce).
    @pl.when(pl.program_id(1) == 0)
    def _():
        o_ref[...] = jnp.zeros_like(o_ref)

    diff = a_ref[...] - d_ref[...]
    o_ref[...] += jnp.sum(diff * diff, axis=1)


# ---------------------------------------------------------------------------
# Wrappers
# ---------------------------------------------------------------------------
def _conv_s2_layer(x, w33, bn_scale):
    """x: (N, H, W, C) bf16 NHWC.  w33: (3, 3, C, Cout) f32.  Returns (N, Ho, Wo, Cout) bf16."""
    n, h, w, c = x.shape
    cout = w33.shape[-1]
    ho = (h - 1) // 2 + 1
    wo = (w - 1) // 2 + 1
    hh, wh = ho + 1, wo + 1
    # conv pad=1 plus (if needed) one extra zero row/col so both spatial dims are even
    xp = jnp.pad(x, ((0, 0), (1, 2 * hh - h - 1), (1, 2 * wh - w - 1), (0, 0)))
    # stride-2 phase decomposition (1x bytes; replaces the 9x im2col HBM blow-up);
    # +8 zero rows keep the dh=dw=1 tap slice in bounds.
    phases = [
        jnp.pad(xp[:, a::2, b::2, :].reshape(n, hh * wh, c), ((0, 0), (0, 8), (0, 0)))
        for a in (0, 1) for b in (0, 1)
    ]
    w9 = (w33 * bn_scale).reshape(9, c, cout).astype(jnp.bfloat16)  # BN scale folded in
    L = ho * wh

    in_spec = pl.BlockSpec((1, hh * wh + 8, c), lambda i: (i, 0, 0))
    # NOTE: the weight block is constant across the grid; single-buffering it
    # (pipeline_mode=pl.Buffered(1)) would save VMEM but is left at the default
    # double buffer for maximum compiler compatibility.
    out = pl.pallas_call(
        _make_conv_s2_kernel(ho, wh),
        out_shape=jax.ShapeDtypeStruct((n, L, cout), jnp.bfloat16),
        grid=(n,),
        in_specs=[in_spec, in_spec, in_spec, in_spec,
                  pl.BlockSpec((9, c, cout), lambda i: (0, 0, 0))],
        out_specs=pl.BlockSpec((1, L, cout), lambda i: (i, 0, 0)),
        compiler_params=pltpu.CompilerParams(dimension_semantics=("parallel",)),
    )(*phases, w9)
    # drop the junk column of the (ho, wo+1) output layout
    return out.reshape(n, ho, wh, cout)[:, :, :wo, :]
    # TODO(synk): for very large spatial inputs this per-image block should be row-banded
    # (grid over output-row bands) to bound VMEM; fine for the shapes used here.


def _final_layer_bce_sum(x, w33):
    """x: (N, H, W, 512) bf16.  Returns (sum of -log(sigmoid(D(x)))), #outputs."""
    n, h, w, c = x.shape
    ho, wo = h, w
    hp, wp = h + 2, w + 2
    xp = jnp.pad(x, ((0, 0), (1, 1), (1, 1), (0, 0)))
    flat = jnp.pad(xp.reshape(n, hp * wp, c), ((0, 0), (0, 8), (0, 0)))
    # broadcast the single output column across 128 lanes -> unmasked MXU/store path
    w9 = jnp.broadcast_to(w33.reshape(9, c, 1), (9, c, 128)).astype(jnp.bfloat16)
    L = ho * wp

    out = pl.pallas_call(
        _make_final_bce_kernel(ho, wo, wp),
        out_shape=jax.ShapeDtypeStruct((n, 1, 128), jnp.float32),
        grid=(n,),
        in_specs=[pl.BlockSpec((1, hp * wp + 8, c), lambda i: (i, 0, 0)),
                  pl.BlockSpec((9, c, 128), lambda i: (0, 0, 0))],
        out_specs=pl.BlockSpec((1, 1, 128), lambda i: (i, 0, 0)),
        compiler_params=pltpu.CompilerParams(dimension_semantics=("parallel",)),
    )(flat, w9)
    return jnp.sum(out) / 128.0, n * ho * wo


def _mse_sum(a, d):
    """Sum of squared differences via a 2-way-parallel, lane-dense (8,128) reduction."""
    a_f = a.reshape(-1).astype(jnp.float32)
    d_f = d.reshape(-1).astype(jnp.float32)
    total = a_f.size
    rows = pl.cdiv(total, 1024)                    # rows of one (8, 128) vreg each
    tr = max(1, min(512, pl.cdiv(rows, 2)))        # rows per grid step (per core-half)
    chunk = 2 * tr * 1024
    padded = pl.cdiv(total, chunk) * chunk
    if padded != total:                            # identical zero pad on both -> diff == 0
        a_f = jnp.pad(a_f, (0, padded - total))
        d_f = jnp.pad(d_f, (0, padded - total))
    r_half = padded // (2 * 1024)
    a4 = a_f.reshape(2, r_half, 8, 128)
    d4 = d_f.reshape(2, r_half, 8, 128)

    spec = pl.BlockSpec((1, tr, 8, 128), lambda c, i: (c, i, 0, 0))
    out = pl.pallas_call(
        _mse_kernel,
        out_shape=jax.ShapeDtypeStruct((2, 8, 128), jnp.float32),
        grid=(2, r_half // tr),
        in_specs=[spec, spec],
        out_specs=pl.BlockSpec((1, 8, 128), lambda c, i: (c, 0, 0)),
        compiler_params=pltpu.CompilerParams(
            dimension_semantics=("parallel", "arbitrary")),
    )(a4, d4)
    return jnp.sum(out)                            # tiny 2x(8,128) finish in plain JAX


def init_discriminator_params(key):
    # Conv2d weights (bias=False in the PyTorch model), deterministic Kaiming-uniform-like
    # init; stored as (kh, kw, cin, cout).
    channels = [(DIMENSION, 64), (64, 128), (128, 256), (256, 512), (512, 1)]
    params = []
    for cin, cout in channels:
        key, sub = jax.random.split(key)
        bound = 1.0 / math.sqrt(cin * 9.0)
        params.append(jax.random.uniform(sub, (3, 3, cin, cout), jnp.float32, -bound, bound))
    return params


def discriminator_bce_sum(x_nchw, params):
    """Discriminator (eval mode) with the BCE-vs-ones term fused into the last layer."""
    x = jnp.transpose(x_nchw, (0, 2, 3, 1)).astype(jnp.bfloat16)   # NHWC, bf16 activations
    bn_scale = 1.0 / math.sqrt(1.0 + BN_EPS)                       # BN(eval, init stats) == scale
    scales = [1.0, bn_scale, bn_scale, bn_scale]
    for w33, sc in zip(params[:4], scales):
        x = _conv_s2_layer(x, w33, sc)
    return _final_layer_bce_sum(x, params[4])


def multi_sigma_adversarial_loss(actual, desire, params, weight=ADV_WEIGHT):
    # actual, desire: (N, C, H, W) float32
    bce_sum, n_disc = discriminator_bce_sum(actual, params)
    mse = _mse_sum(actual, desire) / jnp.float32(actual.size)
    bce = bce_sum / jnp.float32(n_disc)
    # TODO(synk): FastNeuralStylePerceptualLoss (ContentCriterion) is not defined in the
    # provided source, so the content term is omitted here.
    # TODO(synk): fit() (Adam step on the discriminator) is a stateful training side-effect
    # that does not affect the returned loss; not reproduced here.
    return jnp.float32(weight) * bce + mse


if __name__ == "__main__":
    key = jax.random.PRNGKey(0)
    kp, ka, kd = jax.random.split(key, 3)
    params = init_discriminator_params(kp)
    actual = jax.random.normal(ka, (2, DIMENSION, 16, 16), jnp.float32)
    desire = jax.random.normal(kd, (2, DIMENSION, 16, 16), jnp.float32)

    loss = multi_sigma_adversarial_loss(actual, desire, params)
    jax.block_until_ready(loss)
    print("KERNEL_OK")
</pallas_src>

<mosaic_0001>
module attributes {stable_mosaic.version = 11 : i64} {
  func.func @kernel(%arg0: i32, %arg1: memref<1x89x4xbf16, #tpu.memory_space<vmem>>, %arg2: memref<1x89x4xbf16, #tpu.memory_space<vmem>>, %arg3: memref<1x89x4xbf16, #tpu.memory_space<vmem>>, %arg4: memref<1x89x4xbf16, #tpu.memory_space<vmem>>, %arg5: memref<9x4x64xbf16, #tpu.memory_space<vmem>>, %arg6: memref<1x72x64xbf16, #tpu.memory_space<vmem>>) attributes {dimension_semantics = [#tpu.dimension_semantics<parallel>], iteration_bounds = array<i64: 2>, scalar_prefetch = 0 : i64, scratch_operands = 0 : i64, tpu.core_type = #tpu.core_type<tc>, window_params = [{transform_indices = @transform_0, window_bounds = array<i64: 1, 89, 4>}, {transform_indices = @transform_1, window_bounds = array<i64: 1, 89, 4>}, {transform_indices = @transform_2, window_bounds = array<i64: 1, 89, 4>}, {transform_indices = @transform_3, window_bounds = array<i64: 1, 89, 4>}, {pipeline_mode = #tpu.pipeline_mode<synchronous>, transform_indices = @transform_4, window_bounds = array<i64: 9, 4, 64>}, {transform_indices = @transform_5, window_bounds = array<i64: 1, 72, 64>}]} {
    %c0 = arith.constant 0 : index
    %c0_0 = arith.constant 0 : index
    %c0_1 = arith.constant 0 : index
    %0 = vector.load %arg1[%c0, %c0_0, %c0_1] : memref<1x89x4xbf16, #tpu.memory_space<vmem>>, vector<1x72x4xbf16>
    %1 = vector.shape_cast %0 : vector<1x72x4xbf16> to vector<72x4xbf16>
    %c0_2 = arith.constant 0 : index
    %c0_3 = arith.constant 0 : index
    %c0_4 = arith.constant 0 : index
    %2 = vector.load %arg5[%c0_2, %c0_3, %c0_4] : memref<9x4x64xbf16, #tpu.memory_space<vmem>>, vector<1x4x64xbf16>
    %3 = vector.shape_cast %2 : vector<1x4x64xbf16> to vector<4x64xbf16>
    %cst = arith.constant dense<0.000000e+00> : vector<72x64xf32>
    %4 = tpu.matmul %1, %3, %cst {dimension_numbers = #tpu.dot_dimension_numbers<[1], [0], [0], [1], [0, 0, 1, 1], [], []>} : vector<72x4xbf16>, vector<4x64xbf16>, vector<72x64xf32> -> vector<72x64xf32>
    %c0_5 = arith.constant 0 : index
    %c0_6 = arith.constant 0 : index
    %c0_7 = arith.constant 0 : index
    %5 = vector.load %arg2[%c0_5, %c0_6, %c0_7] : memref<1x89x4xbf16, #tpu.memory_space<vmem>>, vector<1x72x4xbf16>
    %6 = vector.shape_cast %5 : vector<1x72x4xbf16> to vector<72x4xbf16>
    %c1 = arith.constant 1 : index
    %c0_8 = arith.constant 0 : index
    %c0_9 = arith.constant 0 : index
    %7 = vector.load %arg5[%c1, %c0_8, %c0_9] : memref<9x4x64xbf16, #tpu.memory_space<vmem>>, vector<1x4x64xbf16>
    %8 = vector.shape_cast %7 : vector<1x4x64xbf16> to vector<4x64xbf16>
    %cst_10 = arith.constant dense<0.000000e+00> : vector<72x64xf32>
    %9 = tpu.matmul %6, %8, %cst_10 {dimension_numbers = #tpu.dot_dimension_numbers<[1], [0], [0], [1], [0, 0, 1, 1], [], []>} : vector<72x4xbf16>, vector<4x64xbf16>, vector<72x64xf32> -> vector<72x64xf32>
    %10 = arith.addf %4, %9 : vector<72x64xf32>
    %c0_11 = arith.constant 0 : index
    %c1_12 = arith.constant 1 : index
    %c0_13 = arith.constant 0 : index
    %11 = vector.load %arg1[%c0_11, %c1_12, %c0_13] : memref<1x89x4xbf16, #tpu.memory_space<vmem>>, vector<1x72x4xbf16>
    %12 = vector.shape_cast %11 : vector<1x72x4xbf16> to vector<72x4xbf16>
    %c2 = arith.constant 2 : index
    %c0_14 = arith.constant 0 : index
    %c0_15 = arith.constant 0 : index
    %13 = vector.load %arg5[%c2, %c0_14, %c0_15] : memref<9x4x64xbf16, #tpu.memory_space<vmem>>, vector<1x4x64xbf16>
    %14 = vector.shape_cast %13 : vector<1x4x64xbf16> to vector<4x64xbf16>
    %cst_16 = arith.constant dense<0.000000e+00> : vector<72x64xf32>
    %15 = tpu.matmul %12, %14, %cst_16 {dimension_numbers = #tpu.dot_dimension_numbers<[1], [0], [0], [1], [0, 0, 1, 1], [], []>} : vector<72x4xbf16>, vector<4x64xbf16>, vector<72x64xf32> -> vector<72x64xf32>
    %16 = arith.addf %10, %15 : vector<72x64xf32>
    %c0_17 = arith.constant 0 : index
    %c0_18 = arith.constant 0 : index
    %c0_19 = arith.constant 0 : index
    %17 = vector.load %arg3[%c0_17, %c0_18, %c0_19] : memref<1x89x4xbf16, #tpu.memory_space<vmem>>, vector<1x72x4xbf16>
    %18 = vector.shape_cast %17 : vector<1x72x4xbf16> to vector<72x4xbf16>
    %c3 = arith.constant 3 : index
    %c0_20 = arith.constant 0 : index
    %c0_21 = arith.constant 0 : index
    %19 = vector.load %arg5[%c3, %c0_20, %c0_21] : memref<9x4x64xbf16, #tpu.memory_space<vmem>>, vector<1x4x64xbf16>
    %20 = vector.shape_cast %19 : vector<1x4x64xbf16> to vector<4x64xbf16>
    %cst_22 = arith.constant dense<0.000000e+00> : vector<72x64xf32>
    %21 = tpu.matmul %18, %20, %cst_22 {dimension_numbers = #tpu.dot_dimension_numbers<[1], [0], [0], [1], [0, 0, 1, 1], [], []>} : vector<72x4xbf16>, vector<4x64xbf16>, vector<72x64xf32> -> vector<72x64xf32>
    %22 = arith.addf %16, %21 : vector<72x64xf32>
    %c0_23 = arith.constant 0 : index
    %c0_24 = arith.constant 0 : index
    %c0_25 = arith.constant 0 : index
    %23 = vector.load %arg4[%c0_23, %c0_24, %c0_25] : memref<1x89x4xbf16, #tpu.memory_space<vmem>>, vector<1x72x4xbf16>
    %24 = vector.shape_cast %23 : vector<1x72x4xbf16> to vector<72x4xbf16>
    %c4 = arith.constant 4 : index
    %c0_26 = arith.constant 0 : index
    %c0_27 = arith.constant 0 : index
    %25 = vector.load %arg5[%c4, %c0_26, %c0_27] : memref<9x4x64xbf16, #tpu.memory_space<vmem>>, vector<1x4x64xbf16>
    %26 = vector.shape_cast %25 : vector<1x4x64xbf16> to vector<4x64xbf16>
    %cst_28 = arith.constant dense<0.000000e+00> : vector<72x64xf32>
    %27 = tpu.matmul %24, %26, %cst_28 {dimension_numbers = #tpu.dot_dimension_numbers<[1], [0], [0], [1], [0, 0, 1, 1], [], []>} : vector<72x4xbf16>, vector<4x64xbf16>, vector<72x64xf32> -> vector<72x64xf32>
    %28 = arith.addf %22, %27 : vector<72x64xf32>
    %c0_29 = arith.constant 0 : index
    %c1_30 = arith.constant 1 : index
    %c0_31 = arith.constant 0 : index
    %29 = vector.load %arg3[%c0_29, %c1_30, %c0_31] : memref<1x89x4xbf16, #tpu.memory_space<vmem>>, vector<1x72x4xbf16>
    %30 = vector.shape_cast %29 : vector<1x72x4xbf16> to vector<72x4xbf16>
    %c5 = arith.constant 5 : index
    %c0_32 = arith.constant 0 : index
    %c0_33 = arith.constant 0 : index
    %31 = vector.load %arg5[%c5, %c0_32, %c0_33] : memref<9x4x64xbf16, #tpu.memory_space<vmem>>, vector<1x4x64xbf16>
    %32 = vector.shape_cast %31 : vector<1x4x64xbf16> to vector<4x64xbf16>
    %cst_34 = arith.constant dense<0.000000e+00> : vector<72x64xf32>
    %33 = tpu.matmul %30, %32, %cst_34 {dimension_numbers = #tpu.dot_dimension_numbers<[1], [0], [0], [1], [0, 0, 1, 1], [], []>} : vector<72x4xbf16>, vector<4x64xbf16>, vector<72x64xf32> -> vector<72x64xf32>
    %34 = arith.addf %28, %33 : vector<72x64xf32>
    %c0_35 = arith.constant 0 : index
    %c9 = arith.constant 9 : index
    %c0_36 = arith.constant 0 : index
    %35 = vector.load %arg1[%c0_35, %c9, %c0_36] : memref<1x89x4xbf16, #tpu.memory_space<vmem>>, vector<1x72x4xbf16>
    %36 = vector.shape_cast %35 : vector<1x72x4xbf16> to vector<72x4xbf16>
    %c6 = arith.constant 6 : index
    %c0_37 = arith.constant 0 : index
    %c0_38 = arith.constant 0 : index
    %37 = vector.load %arg5[%c6, %c0_37, %c0_38] : memref<9x4x64xbf16, #tpu.memory_space<vmem>>, vector<1x4x64xbf16>
    %38 = vector.shape_cast %37 : vector<1x4x64xbf16> to vector<4x64xbf16>
    %cst_39 = arith.constant dense<0.000000e+00> : vector<72x64xf32>
    %39 = tpu.matmul %36, %38, %cst_39 {dimension_numbers = #tpu.dot_dimension_numbers<[1], [0], [0], [1], [0, 0, 1, 1], [], []>} : vector<72x4xbf16>, vector<4x64xbf16>, vector<72x64xf32> -> vector<72x64xf32>
    %40 = arith.addf %34, %39 : vector<72x64xf32>
    %c0_40 = arith.constant 0 : index
    %c9_41 = arith.constant 9 : index
    %c0_42 = arith.constant 0 : index
    %41 = vector.load %arg2[%c0_40, %c9_41, %c0_42] : memref<1x89x4xbf16, #tpu.memory_space<vmem>>, vector<1x72x4xbf16>
    %42 = vector.shape_cast %41 : vector<1x72x4xbf16> to vector<72x4xbf16>
    %c7 = arith.constant 7 : index
    %c0_43 = arith.constant 0 : index
    %c0_44 = arith.constant 0 : index
    %43 = vector.load %arg5[%c7, %c0_43, %c0_44] : memref<9x4x64xbf16, #tpu.memory_space<vmem>>, vector<1x4x64xbf16>
    %44 = vector.shape_cast %43 : vector<1x4x64xbf16> to vector<4x64xbf16>
    %cst_45 = arith.constant dense<0.000000e+00> : vector<72x64xf32>
    %45 = tpu.matmul %42, %44, %cst_45 {dimension_numbers = #tpu.dot_dimension_numbers<[1], [0], [0], [1], [0, 0, 1, 1], [], []>} : vector<72x4xbf16>, vector<4x64xbf16>, vector<72x64xf32> -> vector<72x64xf32>
    %46 = arith.addf %40, %45 : vector<72x64xf32>
    %c0_46 = arith.constant 0 : index
    %c10 = arith.constant 10 : index
    %c0_47 = arith.constant 0 : index
    %47 = vector.load %arg1[%c0_46, %c10, %c0_47] : memref<1x89x4xbf16, #tpu.memory_space<vmem>>, vector<1x72x4xbf16>
    %48 = vector.shape_cast %47 : vector<1x72x4xbf16> to vector<72x4xbf16>
    %c8 = arith.constant 8 : index
    %c0_48 = arith.constant 0 : index
    %c0_49 = arith.constant 0 : index
    %49 = vector.load %arg5[%c8, %c0_48, %c0_49] : memref<9x4x64xbf16, #tpu.memory_space<vmem>>, vector<1x4x64xbf16>
    %50 = vector.shape_cast %49 : vector<1x4x64xbf16> to vector<4x64xbf16>
    %cst_50 = arith.constant dense<0.000000e+00> : vector<72x64xf32>
    %51 = tpu.matmul %48, %50, %cst_50 {dimension_numbers = #tpu.dot_dimension_numbers<[1], [0], [0], [1], [0, 0, 1, 1], [], []>} : vector<72x4xbf16>, vector<4x64xbf16>, vector<72x64xf32> -> vector<72x64xf32>
    %52 = arith.addf %46, %51 : vector<72x64xf32>
    %cst_51 = arith.constant 0.000000e+00 : f32
    %53 = vector.broadcast %cst_51 : f32 to vector<72x64xf32>
    %54 = arith.cmpf ogt, %52, %53 : vector<72x64xf32>
    %cst_52 = arith.constant 2.000000e-01 : f32
    %55 = vector.broadcast %cst_52 : f32 to vector<72x64xf32>
    %56 = arith.mulf %55, %52 : vector<72x64xf32>
    %57 = arith.select %54, %52, %56 : vector<72x64xi1>, vector<72x64xf32>
    %58 = arith.truncf %57 : vector<72x64xf32> to vector<72x64xbf16>
    %c0_53 = arith.constant 0 : index
    %c0_54 = arith.constant 0 : index
    %c0_55 = arith.constant 0 : index
    %59 = vector.load %arg6[%c0_53, %c0_54, %c0_55] : memref<1x72x64xbf16, #tpu.memory_space<vmem>>, vector<1x72x64xbf16>
    %60 = vector.shape_cast %59 : vector<1x72x64xbf16> to vector<72x64xbf16>
    %61 = vector.shape_cast %58 : vector<72x64xbf16> to vector<1x72x64xbf16>
    tpu.vector_store %arg6[%c0_53, %c0_54, %c0_55], %61 {strides = array<i32>} : memref<1x72x64xbf16, #tpu.memory_space<vmem>>, vector<1x72x64xbf16>,
    return
  }
  func.func @transform_0(%arg0: i32) -> (i32, i32, i32) {
    %c0_i32 = arith.constant 0 : i32
    %c0_i32_0 = arith.constant 0 : i32
    %c0_i32_1 = arith.constant 0 : i32
    return %arg0, %c0_i32, %c0_i32_0 : i32, i32, i32
  }
  func.func @transform_1(%arg0: i32) -> (i32, i32, i32) {
    %c0_i32 = arith.constant 0 : i32
    %c0_i32_0 = arith.constant 0 : i32
    %c0_i32_1 = arith.constant 0 : i32
    return %arg0, %c0_i32, %c0_i32_0 : i32, i32, i32
  }
  func.func @transform_2(%arg0: i32) -> (i32, i32, i32) {
    %c0_i32 = arith.constant 0 : i32
    %c0_i32_0 = arith.constant 0 : i32
    %c0_i32_1 = arith.constant 0 : i32
    return %arg0, %c0_i32, %c0_i32_0 : i32, i32, i32
  }
  func.func @transform_3(%arg0: i32) -> (i32, i32, i32) {
    %c0_i32 = arith.constant 0 : i32
    %c0_i32_0 = arith.constant 0 : i32
    %c0_i32_1 = arith.constant 0 : i32
    return %arg0, %c0_i32, %c0_i32_0 : i32, i32, i32
  }
  func.func @transform_4(%arg0: i32) -> (i32, i32, i32) {
    %c0_i32 = arith.constant 0 : i32
    %c0_i32_0 = arith.constant 0 : i32
    %c0_i32_1 = arith.constant 0 : i32
    %c0_i32_2 = arith.constant 0 : i32
    return %c0_i32, %c0_i32_0, %c0_i32_1 : i32, i32, i32
  }
  func.func @transform_5(%arg0: i32) -> (i32, i32, i32) {
    %c0_i32 = arith.constant 0 : i32
    %c0_i32_0 = arith.constant 0 : i32
    %c0_i32_1 = arith.constant 0 : i32
    return %arg0, %c0_i32, %c0_i32_0 : i32, i32, i32
  }
}

</mosaic_0001>

<bundles_post_ra>
// kernel: tpu_custom_call.1
= control target key start
LH: loop header
LB: loop body
LE: loop exit
PB: predicated region body
PF: predicated region fallthrough
CT: control target
= control target key end

     0   :  { %s2402_s18 = smov 0   ;;  %s2796_s0 = inlined_call_operand.vmem [shape: bf16[2,89,4], index: 0, kind: input, shape index: {}]   ;;  %s2797_s1 = inlined_call_operand.vmem [shape: bf16[2,89,4], index: 1, kind: input, shape index: {}]   ;;  %s2798_s2 = inlined_call_operand.vmem [shape: bf16[2,89,4], index: 2, kind: input, shape index: {}]   ;;  %s2799_s3 = inlined_call_operand.vmem [shape: bf16[2,89,4], index: 3, kind: input, shape index: {}]   ;;  %s2800_s4 = inlined_call_operand.vmem [shape: bf16[9,4,64], index: 4, kind: input, shape index: {}]   ;;  %s2801_s5 = inlined_call_operand.vmem [shape: bf16[2,72,64], index: 5, kind: output, shape index: {}]  }
   0x1 LB: > { %s1782_s19 = sadd.s32 4294967295, %s2368_s18   ;;  %p1786_p0 = scmp.ge.s32.totalorder %s2368_s18, 1  ;;  %s2368_s18 = sphi %s2402_s18, %s15_s18  }
   0x2   : > { %p217_p1 = scmp.lt.s32.totalorder %s2368_s18, 3 }
   0x4   : > { %p218_p2 = pnand %p1786_p0, %p217_p1 }
   0x5   : > { %vm346_vm0 = vcmask (!%p218_p2), 1041408   ;;  %v1835_v0 = vld [vmem:[%s2800_s4 + $0x8] sm:$0x3] (!%p218_p2)  ;;  %v1792_v1 = vld [vmem:[%s2800_s4 + $0x2] sm:$0x3] (!%p218_p2)  ;;  %v2370_v2 = vmov (!%p218_p2), 0.0  }
   0x6   : > { %221 = sbr.rel (%p218_p2) target bundleno = 415 (0x19f), region = 40  ;;  %2048 = vmatprep.subr.bf16.mxu0 (!%p218_p2), %v2370_v2  ;;  %1960 = vmatprep.subr.bf16.mxu1 (!%p218_p2), %v2370_v2  ;;  %v2419_v3 = vsel (!%p218_p2), %vm346_vm0, %v1835_v0, 0  ;;  %v348_v4 = vsel (!%p218_p2), %vm346_vm0, %v1792_v1, 0  ;;  %p260_p3 = scmp.lt.s32.totalorder (!%p218_p2), %s1782_s19, 1  ;;  %vm2371_vm1 = vmmov (!%p218_p2), 0   ;;  %vm330_vm2 = vcmask (!%p218_p2), 31744  }
   0x7   : > { %2049 = vmatpush3.bf16.msra.mxu0 (!%p218_p2), %v2419_v3  ;;  %1961 = vmatpush3.bf16.msra.mxu1 (!%p218_p2), %v348_v4  ;;  %v1846_v5 = vld [vmem:[%s2800_s4 + $0xa] sm:$0x3] (!%p218_p2)  ;;  %v295_v6 = vld [vmem:[%s2800_s4] sm:$0x3] (!%p218_p2)  ;;  %vm572_vm3 = vsmask.f32 (!%p218_p2), 7424 }
   0x8   : > { %1962 = vmatprep.mubr.msk.bf16.mxu1 (!%p218_p2), %vm2371_vm1, %v2370_v2  ;;  %2050 = vmatprep.mubr.msk.bf16.mxu0 (!%p218_p2), %vm2371_vm1, %v2370_v2  ;;  %v1069_v9 = vsel (!%p218_p2), %vm346_vm0, %v1846_v5, 0  ;;  %v461_v10 = vsel (!%p218_p2), %vm346_vm0, %v295_v6, 0  ;;  %v1857_v24 = vld [vmem:[%s2800_s4 + $0xc] sm:$0x3] (!%p218_p2)  ;;  %vm1508_vm4 = vcmask (!%p218_p2), 1046528   ;;  %vm1681_vm6 = vcmask (!%p218_p2), 519168  }
   0x9   : > { %2070 = vmatprep.subr.bf16.mxu0 (!%p218_p2), %v2370_v2  ;;  %1982 = vmatprep.subr.bf16.mxu1 (!%p218_p2), %v2370_v2  ;;  %v1244_v29 = vsel (!%p218_p2), %vm346_vm0, %v1857_v24, 0 }
   0xd   : > { %s2803_s19 = smov (!%p260_p3, %s1782_s19), 1 }
   0xe   : > { %s2309_s24 = smul.u32 48, %s2803_s19 }
   0xf   : > { %s2310_s28 = smul.u32 36, %s2803_s19 }
  0x10   : > { %s2438_s29 = scalar_lea.vmem %s2797_s1, %s2309_s24  ;;  %s2447_s9 = scalar_lea.vmem %s2799_s3, %s2309_s24 }
  0x11   : > { %v2321_v7 = vld [vmem:[%s2438_s29] sm:$0xff]   ;;  %v2323_v11 = vld [vmem:[%s2438_s29 + $0x8] sm:$0xff]   ;;  %s2463_s12 = scalar_lea.vmem %s2798_s2, %s2309_s24  ;;  %s2471_s15 = scalar_lea.vmem %s2796_s0, %s2309_s24  ;;  %v2325_v16 = vld [vmem:[%s2438_s29 + $0x10] sm:$0xff]  }
  0x12   : > { %v2322_v8 = vld [vmem:[%s2447_s9] sm:$0xff]   ;;  %1963 = vmatmul.mubr.msk.bf16.vlgmr.msra.gmra.mrb[0].mxu1 %vm330_vm2, %v2321_v7  ;;  %v2324_v12 = vld [vmem:[%s2447_s9 + $0x8] sm:$0xff]   ;;  %v2326_v17 = vld [vmem:[%s2447_s9 + $0x10] sm:$0xff]   ;;  %s2773_s6 = scalar_lea.vmem %s2801_s5, %s2310_s28 }
  0x13   : > { %2051 = vmatmul.mubr.msk.bf16.vlgmr.msra.gmra.mrb[0].mxu0 %vm330_vm2, %v2322_v8  ;;  %1966 = vmatprep.mubr.msk.bf16.mxu1 %vm2371_vm1, %v2370_v2  ;;  %v2328_v13 = vld [vmem:[%s2463_s12] sm:$0xff]   ;;  %v2329_v14 = vld [vmem:[%s2463_s12 + $0x8] sm:$0xff]   ;;  %v2331_v21 = vld [vmem:[%s2463_s12 + $0x10] sm:$0xff]  }
  0x14   : > { %2071 = vmatpush3.bf16.msra.mxu0 %v1069_v9  ;;  %2054 = vmatprep.mubr.msk.bf16.mxu0 %vm2371_vm1, %v2370_v2  ;;  %v1017_v15 = vshll.u32 %v2328_v13, 16  ;;  %v1015_v18 = vshrl.u32 %v2328_v13, 16  ;;  %v1022_v20 = vshll.u32 %v2329_v14, 16  ;;  %v2327_v25 = vld [vmem:[%s2438_s29 + $0x18] sm:$0xff]   ;;  %v1030_v26 = vshll.u32 %v2331_v21, 16  ;;  %v2345_v33 = vld [vmem:[%s2471_s15 + $0x10] sm:$0xff]  }
  0x15   : > { %1983 = vmatpush3.bf16.msra.mxu1 %v461_v10  ;;  %2092 = vmatprep.subr.bf16.mxu0 %v2370_v2  ;;  %v1026_v28 = vshrl.u32 %v2329_v14, 16  ;;  %v2496_v30 = vld [vmem:[%s2463_s12 + $0x18] sm:$0xff]   ;;  %v1034_v32 = vshrl.u32 %v2331_v21, 16  ;;  %v2330_v37 = vld [vmem:[%s2438_s29 + $0x20] ss:$0 sps:$4 sm:$0xff]   ;;  %v589_v39 = vshll.u32 %v2345_v33, 16 }
  0x16   : > { %2004 = vmatprep.subr.bf16.mxu1 %v2370_v2  ;;  %v1019_v19 = vrot.slane %v1017_v15, 1  ;;  %v1024_v23 = vrot.slane %v1022_v20, 1  ;;  %v2499_v31 = vld [vmem:[%s2471_s15 + $0x1c] sm:$0xff]   ;;  %v1032_v35 = vrot.slane %v1030_v26, 1  ;;  %v2512_v40 = vld [vmem:[%s2471_s15 + $0x24] sm:$0x1f]  }
  0x17   : > { %v2347_v34 = vld [vmem:[%s2471_s15 + $0x18] sm:$0xff]   ;;  %v1213_v36 = vshll.u32 %v2499_v31, 16  ;;  %v1217_v41 = vshrl.u32 %v2499_v31, 16  ;;  %v593_v43 = vshrl.u32 %v2345_v33, 16  ;;  %v2349_v45 = vld [vmem:[%s2438_s29 + $0x4] sm:$0xff]   ;;  %v1038_v46 = vshll.u32 %v2496_v30, 16 }
  0x18   : > { %v1020_v22 = vor.u32 %v1019_v19, %v1015_v18  ;;  %v1028_v38 = vor.u32 %v1026_v28, %v1024_v23  ;;  %v597_v44 = vshll.u32 %v2347_v34, 16  ;;  %v2520_v47 = vrot.slane %v589_v39, 1  ;;  %v2350_v49 = vld [vmem:[%s2438_s29 + $0xc] sm:$0xff]   ;;  %v2525_v50 = vld [vmem:[%s2463_s12 + $0x20] sm:$0x1f]   ;;  %v2351_v4 = vld [vmem:[%s2438_s29 + $0x14] sm:$0xff]  }
  0x19   : > { %v2516_v42 = vrot.slane %v1213_v36, 1  ;;  %v1221_v48 = vshll.u32 %v2512_v40, 16  ;;  %v2529_v53 = vld [vmem:[%s2471_s15 + $0x20] sm:$0x1f]   ;;  %v601_v54 = vshrl.u32 %v2347_v34, 16  ;;  %v1365_v58 = vshrl.u32 %v2349_v45, 16 }
  0x1a   : > { %1967 = vmatmul.mubr.msk.bf16.gmra.mrb[4].mxu1 %vm330_vm2, %v2323_v11  ;;  %v1025_v27 = vsel %vm572_vm3, %v1020_v22, %v1024_v23  ;;  %v599_v52 = vrot.slane %v597_v44, 1  ;;  %v1033_v55 = vsel %vm572_vm3, %v1028_v38, %v1032_v35  ;;  %v595_v57 = vor.u32 %v593_v43, %v2520_v47  ;;  %v2332_v9 = vld [vmem:[%s2471_s15] sm:$0xff]   ;;  %v2579_v33 = vld [vmem:[%s2471_s15 + $0x14] sm:$0xff]  }
  0x1b   : > { %2055 = vmatmul.mubr.msk.bf16.gmra.mrb[4].mxu0 %vm330_vm2, %v2324_v12  ;;  %1970 = vmatprep.mubr.msk.bf16.mxu1 %vm2371_vm1, %v2370_v2  ;;  %v1219_v51 = vor.u32 %v1217_v41, %v2516_v42  ;;  %v2532_v56 = vrot.slane %v1221_v48, 1  ;;  %v605_v60 = vshll.u32 %v2529_v53, 16  ;;  %v1367_v61 = vshll.u32 %v2349_v45, 16  ;;  %v1813_v10 = vld [vmem:[%s2800_s4 + $0x4] sm:$0x3]  ;;  %v2353_v14 = vld [vmem:[%s2438_s29 + $0x1c] sm:$0xff]  }
  0x1c   : > { %2058 = vmatprep.mubr.msk.bf16.mxu0 %vm2371_vm1, %v2370_v2  ;;  %v603_v59 = vor.u32 %v601_v54, %v599_v52  ;;  %v1036_v62 = vor.u32 %v1034_v32, %v1032_v35  ;;  %v2542_v0 = vsel %vm572_vm3, %v595_v57, %v599_v52  ;;  %v1372_v1 = vshll.u32 %v2350_v49, 16  ;;  %v2568_v24 = vld [vmem:[%s2438_s29 + $0x24] sm:$0x1f]   ;;  %v2576_v32 = vld [vmem:[%s2471_s15 + $0xc] sm:$0xff]  }
  0x1d   : > { %v2539_v63 = vsel %vm572_vm3, %v1219_v51, %v2532_v56  ;;  %v1040_v5 = vrot.slane %v1038_v46, 1  ;;  %v2548_v6 = vrot.slane %v605_v60, 1  ;;  %v1369_v7 = vrot.slane %v1367_v61, 1  ;;  %v1502_v38 = vld [vmem:[%s2471_s15 + $0x4] sm:$0xe]  ;;  %v2334_v54 = vld [vmem:[%s2471_s15 + $0x8] sm:$0xff]  }
  0x1e   : > { %v1376_v8 = vshrl.u32 %v2350_v49, 16  ;;  %v1042_v11 = vshrl.u32 %v2496_v30, 16  ;;  %v1374_v12 = vrot.slane %v1372_v1, 1  ;;  %v1380_v13 = vshll.u32 %v2351_v4, 16  ;;  %v1152_v48 = vld [vmem:[%s2471_s15 + $0x4] sm:$0xf] }
  0x1f   : > { %v1046_v15 = vshll.u32 %v2525_v50, 16  ;;  %v1384_v18 = vshrl.u32 %v2351_v4, 16  ;;  %v1388_v21 = vshll.u32 %v2353_v14, 16  ;;  %v1041_v22 = vsel %vm572_vm3, %v1036_v62, %v1040_v5  ;;  %v2336_v1 = vld [vmem:[%s2471_s15 + $0x10] sm:$0xff]  }
  0x20   : > { %v1378_v19 = vor.u32 %v1376_v8, %v1374_v12  ;;  %v1382_v20 = vrot.slane %v1380_v13, 1  ;;  %v628_v30 = vsel %vm346_vm0, %v1813_v10, 0  ;;  %v1396_v34 = vshll.u32 %v2568_v24, 16  ;;  %v2337_v10 = vld [vmem:[%s2471_s15 + $0x18] sm:$0xff]  }
  0x21   : > { %v1390_v28 = vrot.slane %v1388_v21, 1  ;;  %v1048_v35 = vrot.slane %v1046_v15, 1  ;;  %v1510_v43 = vrot.slane %v2576_v32, 1  ;;  %v1512_v44 = vrot.slane %v2579_v33, 1 }
  0x22   : > { %1971 = vmatmul.mubr.msk.bf16.gmra.mrb[8].mxu1 %vm330_vm2, %v2325_v16  ;;  %v2561_v16 = vsel %vm572_vm3, %v603_v59, %v2548_v6  ;;  %v2572_v26 = vsel %vm572_vm3, %v1378_v19, %v1382_v20  ;;  %v2590_v39 = vrot.slane %v1396_v34, 1  ;;  %v1044_v45 = vor.u32 %v1042_v11, %v1040_v5  ;;  %v1868_v11 = vld [vmem:[%s2800_s4 + $0xe] sm:$0x3] }
  0x23   : > { %2059 = vmatmul.mubr.msk.bf16.gmra.mrb[8].mxu0 %vm330_vm2, %v2326_v17  ;;  %1974 = vmatprep.mubr.msk.bf16.mxu1 %vm2371_vm1, %v2370_v2  ;;  %v1370_v17 = vor.u32 %v1369_v7, %v1365_v58  ;;  %v1514_v46 = vrot.slane %v2499_v31, 1  ;;  %v2603_v52 = vsel %vm1508_vm4, %v1510_v43, %v1512_v44  ;;  %v1516_v57 = vrot.slane %v2512_v40, 1 }
  0x24   : > { %2072 = vmatprep.mubr.msk.bf16.mxu0 %vm2371_vm1, %v2370_v2  ;;  %v1049_v31 = vsel %vm572_vm3, %v1044_v45, %v1048_v35  ;;  %v1050_v61 = vshrl.u32 %v2525_v50, 16  ;;  %v1197_v8 = vshll.u32 %v2576_v32, 16  ;;  %v1205_v15 = vshll.u32 %v2579_v33, 16 }
  0x25   : > { %v2565_v23 = vsel %vm572_vm3, %v1370_v17, %v1374_v12  ;;  %v2614_v60 = vsel %vm1508_vm4, %v1514_v46, %v1516_v57  ;;  %v2342_v12 = vld [vmem:[%s2471_s15] sm:$0xff]   ;;  %v1419_v17 = vsel %vm346_vm0, %v1868_v11, 0 }
  0x26   : > { %v1052_v4 = vor.u32 %v1050_v61, %v1048_v35  ;;  %v576_v19 = vshll.u32 %v2342_v12, 16  ;;  %v1207_v21 = vrot.slane %v1205_v15, 1 }
  0x2a   : > { %1975 = vmatmul.mubr.msk.bf16.gmra.mrb[12].mxu1 %vm330_vm2, %v2327_v25  ;;  %v1153_v25 = vld [vmem:[%s2471_s15 + $0x8] sm:$0xf] }
  0x2b   : > { %2073 = vmatmul.mubr.msk.bf16.vlgmr.msra.gmra.mrb[0].mxu0 %vm330_vm2, %v1025_v27  ;;  %1978 = vmatprep.mubr.msk.bf16.mxu1 %vm2371_vm1, %v2370_v2  ;;  %v1386_v27 = vor.u32 %v1384_v18, %v1382_v20  ;;  %v1880_v41 = vcombine.low %v1502_v38, %v1153_v25  ;;  %v1858_v59 = vcombine.low %v1152_v48, %v1153_v25  ;;  %v2343_v18 = vld [vmem:[%s2471_s15 + $0x8] sm:$0xff]   ;;  %v574_v25 = vshrl.u32 %v2342_v12, 16 }
  0x2c   : > { %2093 = vmatpush3.bf16.msra.mxu0 %v1244_v29  ;;  %2076 = vmatprep.mubr.msk.bf16.mxu0 %vm2371_vm1, %v2370_v2  ;;  %v1392_v29 = vshrl.u32 %v2353_v14, 16  ;;  %v1201_v14 = vshrl.u32 %v2576_v32, 16 }
  0x2d   : > { %2114 = vmatprep.subr.bf16.mxu0 %v2370_v2  ;;  %v2584_v36 = vsel %vm572_vm3, %v1386_v27, %v1390_v28  ;;  %v1509_v51 = vrot.slane %v1880_v41, 1  ;;  %v1192_v62 = vshll.u32 %v1858_v59, 16  ;;  %v1190_v5 = vshrl.u32 %v1858_v59, 16 }
  0x2e   : > { %v578_v27 = vrot.slane %v576_v19, 1 }
  0x2f   : > { %v2609_v58 = vsel %vm1508_vm4, %v1509_v51, %v1510_v43  ;;  %v1194_v7 = vrot.slane %v1192_v62, 1 }
  0x30   : > { %v579_v32 = vor.u32 %v578_v27, %v574_v25 }
  0x31   : > { %v1195_v50 = vor.u32 %v1194_v7, %v1190_v5 }
  0x32   : > { %1979 = vmatmul.mubr.msk.bf16.gmra.mrb[16].mxu1 %vm330_vm2, %v2330_v37  ;;  %v1394_v37 = vor.u32 %v1392_v29, %v1390_v28  ;;  %v581_v28 = vshll.u32 %v2343_v18, 16 }
  0x33   : > { %2077 = vmatmul.mubr.msk.bf16.gmra.mrb[4].mxu0 %vm330_vm2, %v1033_v55  ;;  %1984 = vmatprep.mubr.msk.bf16.mxu1 %vm2371_vm1, %v2370_v2  ;;  %v2606_v55 = vsel %vm1508_vm4, %v1512_v44, %v1514_v46 }
  0x34   : > { %2080 = vmatprep.mubr.msk.bf16.mxu0 %vm2371_vm1, %v2370_v2  ;;  %v2601_v49 = vsel %vm572_vm3, %v1394_v37, %v2590_v39  ;;  %v583_v34 = vrot.slane %v581_v28, 1  ;;  %v1824_v37 = vld [vmem:[%s2800_s4 + $0x6] sm:$0x3] }
  0x35   : > { %v761_v43 = vsel %vm346_vm0, %v1824_v37, 0 }
  0x36   : > { %v584_v38 = vsel %vm572_vm3, %v579_v32, %v583_v34 }
  0x3a   : > { %1985 = vmatmul.mubr.msk.bf16.vlgmr.msra.gmra.mrb[0].mxu1 %vm330_vm2, %v2332_v9  ;;  %v1199_v9 = vrot.slane %v1197_v8, 1 }
  0x3b   : > { %2081 = vmatmul.mubr.msk.bf16.gmra.mrb[8].mxu0 %vm330_vm2, %v1041_v22  ;;  %1988 = vmatprep.mubr.msk.bf16.mxu1 %vm2371_vm1, %v2370_v2  ;;  %v2340_v22 = vld [vmem:[%s2471_s15 + $0x20] ss:$0 sps:$4 sm:$0xff]  }
  0x3c   : > { %2084 = vmatprep.mubr.msk.bf16.mxu0 %vm2371_vm1, %v2370_v2  ;;  %2005 = vmatpush3.bf16.msra.mxu1 %v628_v30  ;;  %v1200_v13 = vsel %vm572_vm3, %v1195_v50, %v1199_v9  ;;  %v1203_v20 = vor.u32 %v1201_v14, %v1199_v9  ;;  %v1209_v30 = vshrl.u32 %v2579_v33, 16  ;;  %v585_v33 = vshrl.u32 %v2343_v18, 16 }
  0x3d   : > { %2026 = vmatprep.subr.bf16.mxu1 %v2370_v2 }
  0x3e   : > { %v1208_v29 = vsel %vm572_vm3, %v1203_v20, %v1207_v21  ;;  %v1211_v35 = vor.u32 %v1209_v30, %v1207_v21  ;;  %v587_v44 = vor.u32 %v585_v33, %v583_v34 }
  0x40   : > { %v1216_v41 = vsel %vm572_vm3, %v1211_v35, %v2516_v42  ;;  %v592_v45 = vsel %vm572_vm3, %v587_v44, %v2520_v47  ;;  %v1225_v42 = vshrl.u32 %v2512_v40, 16  ;;  %v1879_v47 = vld [vmem:[%s2800_s4 + $0x10] sm:$0x3] }
  0x42   : > { %1989 = vmatmul.mubr.msk.bf16.gmra.mrb[4].mxu1 %vm330_vm2, %v2334_v54  ;;  %v1227_v46 = vor.u32 %v1225_v42, %v2532_v56  ;;  %v609_v56 = vshrl.u32 %v2529_v53, 16  ;;  %v2352_v53 = vld [vmem:[%s2463_s12] sm:$0xff]  }
  0x43   : > { %2085 = vmatmul.mubr.msk.bf16.gmra.mrb[12].mxu0 %vm330_vm2, %v1049_v31  ;;  %1992 = vmatprep.mubr.msk.bf16.mxu1 %vm2371_vm1, %v2370_v2 }
  0x44   : > { %2088 = vmatprep.mubr.msk.bf16.mxu0 %vm2371_vm1, %v2370_v2 }
  0x4a   : > { %1993 = vmatmul.mubr.msk.bf16.gmra.mrb[8].mxu1 %vm330_vm2, %v2336_v1 }
  0x4b   : > { %2089 = vmatmul.mubr.msk.bf16.gmra.mrb[16].mxu0 %vm330_vm2, %v1052_v4  ;;  %1996 = vmatprep.mubr.msk.bf16.mxu1 %vm2371_vm1, %v2370_v2 }
  0x4c   : > { %2094 = vmatprep.mubr.msk.bf16.mxu0 %vm2371_vm1, %v2370_v2 }
  0x52   : > { %1997 = vmatmul.mubr.msk.bf16.gmra.mrb[12].mxu1 %vm330_vm2, %v2337_v10 }
  0x53   : > { %2095 = vmatmul.mubr.msk.bf16.vlgmr.msra.gmra.mrb[0].mxu0 %vm330_vm2, %v1200_v13  ;;  %2000 = vmatprep.mubr.msk.bf16.mxu1 %vm2371_vm1, %v2370_v2 }
  0x54   : > { %2115 = vmatpush3.bf16.msra.mxu0 %v1419_v17  ;;  %2098 = vmatprep.mubr.msk.bf16.mxu0 %vm2371_vm1, %v2370_v2 }
  0x55   : > { %2136 = vmatprep.subr.bf16.mxu0 %v2370_v2 }
  0x5a   : > { %2001 = vmatmul.mubr.msk.bf16.gmra.mrb[16].mxu1 %vm330_vm2, %v2340_v22 }
  0x5b   : > { %2099 = vmatmul.mubr.msk.bf16.gmra.mrb[4].mxu0 %vm330_vm2, %v1208_v29  ;;  %2006 = vmatprep.mubr.msk.bf16.mxu1 %vm2371_vm1, %v2370_v2 }
  0x5c   : > { %2102 = vmatprep.mubr.msk.bf16.mxu0 %vm2371_vm1, %v2370_v2 }
  0x62   : > { %2007 = vmatmul.mubr.msk.bf16.vlgmr.msra.gmra.mrb[0].mxu1 %vm330_vm2, %v584_v38 }
  0x63   : > { %2103 = vmatmul.mubr.msk.bf16.gmra.mrb[8].mxu0 %vm330_vm2, %v1216_v41  ;;  %2010 = vmatprep.mubr.msk.bf16.mxu1 %vm2371_vm1, %v2370_v2 }
  0x64   : > { %2106 = vmatprep.mubr.msk.bf16.mxu0 %vm2371_vm1, %v2370_v2  ;;  %2027 = vmatpush3.bf16.msra.mxu1 %v761_v43 }
  0x65   : > { %2158 = vmatprep.subr.bf16.mxu1 %v2370_v2 }
  0x6a   : > { %2011 = vmatmul.mubr.msk.bf16.gmra.mrb[4].mxu1 %vm330_vm2, %v592_v45 }
  0x6b   : > { %2107 = vmatmul.mubr.msk.bf16.gmra.mrb[12].mxu0 %vm330_vm2, %v2539_v63  ;;  %2014 = vmatprep.mubr.msk.bf16.mxu1 %vm2371_vm1, %v2370_v2  ;;  %v1534_v63 = vsel %vm346_vm0, %v1879_v47, 0 }
  0x6c   : > { %2110 = vmatprep.mubr.msk.bf16.mxu0 %vm2371_vm1, %v2370_v2 }
  0x72   : > { %2015 = vmatmul.mubr.msk.bf16.gmra.mrb[8].mxu1 %vm330_vm2, %v2542_v0  ;;  %v611_v0 = vor.u32 %v609_v56, %v2548_v6  ;;  %v2354_v6 = vld [vmem:[%s2463_s12 + $0x8] sm:$0xff]  }
  0x73   : > { %2111 = vmatmul.mubr.msk.bf16.gmra.mrb[16].mxu0 %vm330_vm2, %v1227_v46  ;;  %2018 = vmatprep.mubr.msk.bf16.mxu1 %vm2371_vm1, %v2370_v2 }
  0x74   : > { %2116 = vmatprep.mubr.msk.bf16.mxu0 %vm2371_vm1, %v2370_v2 }
  0x7a   : > { %2019 = vmatmul.mubr.msk.bf16.gmra.mrb[12].mxu1 %vm330_vm2, %v2561_v16  ;;  %v1400_v16 = vshrl.u32 %v2568_v24, 16  ;;  %v2359_v24 = vld [vmem:[%s2463_s12 + $0x20] ss:$0 sps:$4 sm:$0xff]  }
  0x7b   : > { %2117 = vmatmul.mubr.msk.bf16.vlgmr.msra.gmra.mrb[0].mxu0 %vm330_vm2, %v2565_v23  ;;  %2022 = vmatprep.mubr.msk.bf16.mxu1 %vm2371_vm1, %v2370_v2  ;;  %v2356_v23 = vld [vmem:[%s2463_s12 + $0x10] sm:$0xff]  }
  0x7c   : > { %2137 = vmatpush3.bf16.msra.mxu0 %v1534_v63  ;;  %2120 = vmatprep.mubr.msk.bf16.mxu0 %vm2371_vm1, %v2370_v2 }
  0x82   : > { %2023 = vmatmul.mubr.msk.bf16.gmra.mrb[16].mxu1 %vm330_vm2, %v611_v0 }
  0x83   : > { %2121 = vmatmul.mubr.msk.bf16.gmra.mrb[4].mxu0 %vm330_vm2, %v2572_v26  ;;  %2028 = vmatprep.mubr.msk.bf16.mxu1 %vm2371_vm1, %v2370_v2  ;;  %v1402_v26 = vor.u32 %v1400_v16, %v2590_v39  ;;  %v2361_v39 = vld [vmem:[%s2447_s9 + $0x20] ss:$0 sps:$4 sm:$0xff]  }
  0x84   : > { %2124 = vmatprep.mubr.msk.bf16.mxu0 %vm2371_vm1, %v2370_v2 }
  0x8a   : > { %2029 = vmatmul.mubr.msk.bf16.vlgmr.msra.gmra.mrb[0].mxu1 %vm330_vm2, %v2352_v53 }
  0x8b   : > { %2125 = vmatmul.mubr.msk.bf16.gmra.mrb[8].mxu0 %vm330_vm2, %v2584_v36  ;;  %2032 = vmatprep.mubr.msk.bf16.mxu1 %vm2371_vm1, %v2370_v2  ;;  %v2360_v36 = vld [vmem:[%s2447_s9 + $0x18] sm:$0xff]  }
  0x8c   : > { %2128 = vmatprep.mubr.msk.bf16.mxu0 %vm2371_vm1, %v2370_v2  ;;  %2159 = vmatpush3.bf16.msra.mxu1 %v2419_v3  ;;  %v2357_v3 = vld [vmem:[%s2463_s12 + $0x18] sm:$0xff]  }
  0x92   : > { %2033 = vmatmul.mubr.msk.bf16.gmra.mrb[4].mxu1 %vm330_vm2, %v2354_v6 }
  0x93   : > { %2129 = vmatmul.mubr.msk.bf16.gmra.mrb[12].mxu0 %vm330_vm2, %v2601_v49  ;;  %2036 = vmatprep.mubr.msk.bf16.mxu1 %vm2371_vm1, %v2370_v2 }
  0x94   : > { %2132 = vmatprep.mubr.msk.bf16.mxu0 %vm2371_vm1, %v2370_v2 }
  0x9a   : > { %2037 = vmatmul.mubr.msk.bf16.gmra.mrb[8].mxu1 %vm330_vm2, %v2356_v23 }
  0x9b   : > { %2133 = vmatmul.mubr.msk.bf16.gmra.mrb[16].mxu0 %vm330_vm2, %v1402_v26  ;;  %2040 = vmatprep.mubr.msk.bf16.mxu1 %vm2371_vm1, %v2370_v2 }
  0x9c   : > { %2138 = vmatprep.mubr.msk.bf16.mxu0 %vm2371_vm1, %v2370_v2 }
  0xa2   : > { %2041 = vmatmul.mubr.msk.bf16.gmra.mrb[12].mxu1 %vm330_vm2, %v2357_v3 }
  0xa3   : > { %2139 = vmatmul.mubr.msk.bf16.vlgmr.msra.gmra.mrb[0].mxu0 %vm330_vm2, %v2609_v58  ;;  %2044 = vmatprep.mubr.msk.bf16.mxu1 %vm2371_vm1, %v2370_v2 }
  0xa4   : > { %2142 = vmatprep.mubr.msk.bf16.mxu0 %vm2371_vm1, %v2370_v2 }
  0xaa   : > { %2045 = vmatmul.mubr.msk.bf16.gmra.mrb[16].mxu1 %vm330_vm2, %v2359_v24 }
  0xab   : > { %2143 = vmatmul.mubr.msk.bf16.gmra.mrb[4].mxu0 %vm330_vm2, %v2603_v52  ;;  %2062 = vmatprep.mubr.msk.bf16.mxu1 %vm2371_vm1, %v2370_v2 }
  0xac   : > { %2146 = vmatprep.mubr.msk.bf16.mxu0 %vm2371_vm1, %v2370_v2 }
  0xb2   : > { %2063 = vmatmul.mubr.msk.bf16.vlgmr.msra.gmra.mrb[12].mxu1 %vm330_vm2, %v2360_v36 }
  0xb3   : > { %2147 = vmatmul.mubr.msk.bf16.gmra.mrb[8].mxu0 %vm330_vm2, %v2606_v55  ;;  %2066 = vmatprep.mubr.msk.bf16.mxu1 %vm2371_vm1, %v2370_v2 }
  0xb4   : > { %2150 = vmatprep.mubr.msk.bf16.mxu0 %vm2371_vm1, %v2370_v2 }
  0xba   : > { %2067 = vmatmul.mubr.msk.bf16.gmra.mrb[16].mxu1 %vm330_vm2, %v2361_v39 }
  0xbb   : > { %2151 = vmatmul.mubr.msk.bf16.gmra.mrb[12].mxu0 %vm330_vm2, %v2614_v60 }
  0xbc   : > { %2154 = vmatprep.mubr.msk.bf16.mxu0 %vm2371_vm1, %v2370_v2 }
  0xc3   : > { %2155 = vmatmul.mubr.msk.bf16.gmra.mrb[16].mxu0 %vm330_vm2, %v1516_v57 }
 0x15d   : > { %v797_v48 = vpop.f32.mrb[0].mxu1 }
 0x15e   : > { %v2030_v49 = vpop.f32.mrb[1].mxu1 }
 0x15f   : > { %v800_v51 = vpop.f32.mrb[2].mxu1 }
 0x160   : > { %v2031_v52 = vpop.f32.mrb[3].mxu1 }
 0x165   : > { %v805_v54 = vpop.f32.mrb[4].mxu1 }
 0x166   : > { %v2034_v55 = vpop.f32.mrb[5].mxu1 }
 0x167   : > { %v808_v58 = vpop.f32.mrb[6].mxu1 }
 0x168   : > { %v2035_v31 = vpop.f32.mrb[7].mxu1 }
 0x16d   : > { %v813_v59 = vpop.f32.mrb[8].mxu1 }
 0x16e   : > { %v2038_v61 = vpop.f32.mrb[9].mxu1 }
 0x16f   : > { %v816_v62 = vpop.f32.mrb[10].mxu1 }
 0x170   : > { %v2039_v60 = vpop.f32.mrb[11].mxu1 }
 0x176   : > { %v1570_v1 = vpop.f32.mrb[0].mxu0 }
 0x177   : > { %v2160_v4 = vadd.f32 %v1570_v1, %v797_v48  ;;  %v2140_v2 = vpop.f32.mrb[1].mxu0 }
 0x178   : > { %v1573_v5 = vpop.f32.mrb[2].mxu0 }
 0x179   : > { %vm1617_vm5 = vcmp.gt.f32.partialorder %v2160_v4, 0.0  ;;  %v1626_v40 = vmul.f32 0.2, %v2160_v4  ;;  %v2161_v57 = vadd.f32 %v1573_v5, %v800_v51  ;;  %v2141_v7 = vpop.f32.mrb[3].mxu0 }
 0x17b   : > { %v1635_v8 = vsel %vm1617_vm5, %v2160_v4, %v1626_v40  ;;  %vm1618_vm7 = vcmp.gt.f32.partialorder %v2161_v57, 0.0  ;;  %v1627_v50 = vmul.f32 0.2, %v2161_v57 }
 0x17c   : > { %v1897_v9 = vpack.c.bf16 %v1635_v8, %v1635_v8 }
 0x17d   : > { %v1636_v10 = vsel %vm1618_vm7, %v2161_v57, %v1627_v50 }
 0x17e   : > { %1682 = vst.msk [vmem:[%s2773_s6] sm:$0xf] %vm1681_vm6, %v1897_v9  ;;  %v1898_v11 = vpack.c.bf16 %v1636_v10, %v1636_v10  ;;  %v1578_v12 = vpop.f32.mrb[4].mxu0 }
 0x17f   : > { %v2162_v13 = vadd.f32 %v1578_v12, %v805_v54  ;;  %v2144_v14 = vpop.f32.mrb[5].mxu0 }
 0x180   : > { %1683 = vst.msk [vmem:[%s2773_s6 + $0x4] sm:$0xf] %vm1681_vm6, %v1898_v11  ;;  %v1581_v15 = vpop.f32.mrb[6].mxu0 }
 0x181   : > { %vm1619_vm8 = vcmp.gt.f32.partialorder %v2162_v13, 0.0  ;;  %v1628_v17 = vmul.f32 0.2, %v2162_v13  ;;  %v2163_v18 = vadd.f32 %v1581_v15, %v808_v58  ;;  %v2145_v19 = vpop.f32.mrb[7].mxu0 }
 0x183   : > { %v1637_v20 = vsel %vm1619_vm8, %v2162_v13, %v1628_v17  ;;  %vm1620_vm9 = vcmp.gt.f32.partialorder %v2163_v18, 0.0  ;;  %v1629_v21 = vmul.f32 0.2, %v2163_v18 }
 0x184   : > { %v1899_v22 = vpack.c.bf16 %v1637_v20, %v1637_v20 }
 0x185   : > { %v1638_v25 = vsel %vm1620_vm9, %v2163_v18, %v1629_v21  ;;  %v954_v27 = vpop.f32.mrb[12].mxu1 }
 0x186   : > { %1684 = vst.msk [vmem:[%s2773_s6 + $0x8] sm:$0xf] %vm1681_vm6, %v1899_v22  ;;  %v1900_v28 = vpack.c.bf16 %v1638_v25, %v1638_v25  ;;  %v1586_v29 = vpop.f32.mrb[8].mxu0  ;;  %v2064_v30 = vpop.f32.mrb[13].mxu1 }
 0x187   : > { %v2164_v32 = vadd.f32 %v1586_v29, %v813_v59  ;;  %v2148_v34 = vpop.f32.mrb[9].mxu0  ;;  %v957_v35 = vpop.f32.mrb[14].mxu1 }
 0x188   : > { %1685 = vst.msk [vmem:[%s2773_s6 + $0xc] sm:$0xf] %vm1681_vm6, %v1900_v28  ;;  %v1589_v37 = vpop.f32.mrb[10].mxu0  ;;  %v2065_v38 = vpop.f32.mrb[15].mxu1 }
 0x189   : > { %vm1621_vm10 = vcmp.gt.f32.partialorder %v2164_v32, 0.0  ;;  %v1630_v33 = vmul.f32 0.2, %v2164_v32  ;;  %v2165_v41 = vadd.f32 %v1589_v37, %v816_v62  ;;  %v2149_v43 = vpop.f32.mrb[11].mxu0 }
 0x18b   : > { %v1639_v44 = vsel %vm1621_vm10, %v2164_v32, %v1630_v33  ;;  %vm1622_vm11 = vcmp.gt.f32.partialorder %v2165_v41, 0.0  ;;  %v1631_v45 = vmul.f32 0.2, %v2165_v41 }
 0x18c   : > { %v1901_v42 = vpack.c.bf16 %v1639_v44, %v1639_v44 }
 0x18d   : > { %v1640_v46 = vsel %vm1622_vm11, %v2165_v41, %v1631_v45  ;;  %v962_v47 = vpop.f32.mrb[16].mxu1 }
 0x18e   : > { %1686 = vst.msk [vmem:[%s2773_s6 + $0x10] sm:$0xf] %vm1681_vm6, %v1901_v42  ;;  %v1902_v63 = vpack.c.bf16 %v1640_v46, %v1640_v46  ;;  %v1594_v56 = vpop.f32.mrb[12].mxu0  ;;  %v2068_v0 = vpop.f32.mrb[17].mxu1 }
 0x18f   : > { %v2166_v53 = vadd.f32 %v1594_v56, %v954_v27  ;;  %v2152_v6 = vpop.f32.mrb[13].mxu0  ;;  %v965_v16 = vpop.f32.mrb[18].mxu1 }
 0x190   : > { %1687 = vst.msk [vmem:[%s2773_s6 + $0x14] sm:$0xf] %vm1681_vm6, %v1902_v63  ;;  %v1597_v23 = vpop.f32.mrb[14].mxu0  ;;  %v2069_v26 = vpop.f32.mrb[19].mxu1 }
 0x191   : > { %vm1623_vm12 = vcmp.gt.f32.partialorder %v2166_v53, 0.0  ;;  %v1632_v3 = vmul.f32 0.2, %v2166_v53  ;;  %v2167_v24 = vadd.f32 %v1597_v23, %v957_v35  ;;  %v2153_v36 = vpop.f32.mrb[15].mxu0 }
 0x193   : > { %v1641_v39 = vsel %vm1623_vm12, %v2166_v53, %v1632_v3  ;;  %vm1624_vm13 = vcmp.gt.f32.partialorder %v2167_v24, 0.0  ;;  %v1633_v48 = vmul.f32 0.2, %v2167_v24 }
 0x194   : > { %v1903_v49 = vpack.c.bf16 %v1641_v39, %v1641_v39 }
 0x195   : > { %v1642_v51 = vsel %vm1624_vm13, %v2167_v24, %v1633_v48 }
 0x196   : > { %1688 = vst.msk [vmem:[%s2773_s6 + $0x18] sm:$0xf] %vm1681_vm6, %v1903_v49  ;;  %v1904_v52 = vpack.c.bf16 %v1642_v51, %v1642_v51  ;;  %v1602_v54 = vpop.f32.mrb[16].mxu0 }
 0x197   : > { %v2168_v55 = vadd.f32 %v1602_v54, %v962_v47  ;;  %v2156_v58 = vpop.f32.mrb[17].mxu0 }
 0x198   : > { %1689 = vst.msk [vmem:[%s2773_s6 + $0x1c] sm:$0xf] %vm1681_vm6, %v1904_v52  ;;  %v1605_v31 = vpop.f32.mrb[18].mxu0 }
 0x199   : > { %vm1625_vm14 = vcmp.gt.f32.partialorder %v2168_v55, 0.0  ;;  %v1634_v59 = vmul.f32 0.2, %v2168_v55  ;;  %v2157_v61 = vpop.f32.mrb[19].mxu0 }
 0x19b   : > { %v1643_v62 = vsel %vm1625_vm14, %v2168_v55, %v1634_v59 }
 0x19c   : > { %v1905_v60 = vpack.c.bf16 %v1643_v62, %v1643_v62 }
 0x19e   : > { %1690 = vst.msk [vmem:[%s2773_s6 + $0x20] sm:$0xf] %vm1681_vm6, %v1905_v60 }
 0x19f PF: > { %s15_s18 = sadd.s32 1, %s2368_s18  }
 0x1a0   : > { %p12_p4 = scmp.ge.s32.totalorder %s15_s18, 4  }
 0x1a2   :  { %14 = sbr.rel (!%p12_p4) target bundleno = 1 (0x1), region = 87 }

</bundles_post_ra>
